<compile_context>
chip_gen: v5e
topology: v5e:2x2
jax: 0.10.0
libtpu: 0.0.40
codegen_flags: <defaults>
</compile_context>

<pallas_src>
import functools

import jax
import jax.numpy as jnp
import numpy as np
from jax.experimental import pallas as pl
from jax.experimental.pallas import tpu as pltpu


def _fold_sum_kernel(u_ref, inv_ref, out_ref, *, n_off):
    """Sum pre-shifted slabs for one (channel band, lane band) and normalize.

    u_ref  : (n_off, cb, lb)  pre-shifted slabs (zeros where a sub-tile does
                              not touch this output region)
    inv_ref: (1, lb)          reciprocal coverage count = 1/fold(unfold(1))
    out_ref: (cb, lb)         normalized folded pixels for this band
    """
    acc = u_ref[0]
    for m in range(1, n_off):          # n_off == (k // stride)**2 == 9: tiny unroll
        acc = acc + u_ref[m]
    out_ref[...] = acc * inv_ref[...]


def _place_2d(arr, off_h, off_w, out_h, out_w):
    """Place `arr` (..., H, W) at (off_h, off_w) inside a zero canvas of size
    (out_h, out_w), cropping whatever falls outside the canvas."""
    h, w = arr.shape[-2], arr.shape[-1]
    src_h_lo, src_h_hi = max(0, -off_h), min(h, out_h - off_h)
    src_w_lo, src_w_hi = max(0, -off_w), min(w, out_w - off_w)
    if src_h_hi <= src_h_lo or src_w_hi <= src_w_lo:
        return jnp.zeros(arr.shape[:-2] + (out_h, out_w), arr.dtype)
    piece = arr[..., src_h_lo:src_h_hi, src_w_lo:src_w_hi]
    pads = ([(0, 0)] * (arr.ndim - 2)
            + [(off_h + src_h_lo, out_h - (off_h + src_h_hi)),
               (off_w + src_w_lo, out_w - (off_w + src_w_hi))])
    return jnp.pad(piece, pads)


def _coverage_1d(n_blocks, k, stride, length):
    c = np.zeros(length, np.float32)
    for i in range(n_blocks):
        c[i * stride:i * stride + k] += 1.0
    return c


def _round_up(n, m):
    return ((n + m - 1) // m) * m


def block_fold(x, paddings, row, col, *, wsize=15, wstride=5):
    """JAX/Pallas equivalent of Block_fold.forward.

    x        : (num, C, wsize, wsize) float array of image blocks
    paddings : (left, right, top, bottom) ints (F.pad ordering)
    row, col : spatial size of the reconstructed image
    returns  : (1, C, row, col) float32
    """
    num, C, k, k2 = x.shape
    assert k == wsize and k2 == wsize

    # --- padding-selection logic copied verbatim from the PyTorch module ----
    block_size1 = (row + 2 * paddings[2] - (wsize - 1) - 1) / wstride + 1
    block_size2 = (col + 2 * paddings[0] - (wsize - 1) - 1) / wstride + 1
    if block_size1 * block_size2 != num:
        pad = [paddings[3], paddings[1]]
    else:
        pad = [paddings[2], paddings[0]]
    pad_h, pad_w = int(pad[0]), int(pad[1])

    s_ = int(wstride)
    n_h = (row + 2 * pad_h - wsize) // s_ + 1
    n_w = (col + 2 * pad_w - wsize) // s_ + 1
    assert n_h * n_w == num, "block count inconsistent with (row, col, padding)"
    # TODO(synk): wsize % wstride != 0 would need a per-block accumulation
    # path; GT-HAD only ever uses wsize=15, wstride=5.
    assert wsize % wstride == 0, "kernel assumes wsize is a multiple of wstride"
    # TODO(synk): the PyTorch try/except around F.fold (pdb.set_trace) has no
    # kernel equivalent; inconsistent shapes raise at trace time instead.

    r = wsize // s_                      # sub-tiles per block edge (3)
    n_off = r * r                        # shifted-add offsets (9)
    h_pad = row + 2 * pad_h
    w_pad = col + 2 * pad_w

    # --- reciprocal coverage mask (== 1 / fold(unfold(ones))), trace-time ---
    cov = np.outer(_coverage_1d(n_h, wsize, s_, h_pad),
                   _coverage_1d(n_w, wsize, s_, w_pad)).astype(np.float32)
    cov_win = cov[pad_h:pad_h + row, pad_w:pad_w + col]
    assert (cov_win > 0).all(), \
        "fold mask has uncovered output pixels (PyTorch would produce NaN/inf)"
    L = row * col
    L_pad = _round_up(L, 128)            # lane-dense, unmasked stores
    inv_np = np.ones((L_pad,), np.float32)
    inv_np[:L] = (1.0 / cov_win).reshape(-1)
    inv = jnp.asarray(inv_np).reshape(1, L_pad)

    # --- rearrange blocks into pre-shifted slabs in OUTPUT coordinates ------
    # xr axes: (i, j, c, a, p, b, q); block (i, j), sub-tile offset (a, b).
    # Slab (a, b): the n_h x n_w grid of 5x5 sub-tiles placed at output offset
    # (a*s - pad_h, b*s - pad_w); out-of-window pieces are cropped to zeros.
    xr = x.astype(jnp.float32).reshape(n_h, n_w, C, r, s_, r, s_)
    slabs = []
    for a in range(r):
        for b in range(r):
            sub = xr[:, :, :, a, :, b, :]                 # (n_h, n_w, C, s, s)
            sub = jnp.transpose(sub, (2, 0, 3, 1, 4))     # (C, n_h, s, n_w, s)
            sub = sub.reshape(C, n_h * s_, n_w * s_)
            slabs.append(_place_2d(sub, a * s_ - pad_h, b * s_ - pad_w, row, col))
    u = jnp.stack(slabs, axis=0).reshape(n_off, C, L)     # (n_off, C, row*col)
    if L_pad != L:
        u = jnp.pad(u, ((0, 0), (0, 0), (0, L_pad - L)))

    # --- channel banding (sublane axis) keeps per-step blocks inside VMEM ---
    budget = 4 * 1024 * 1024                              # bytes for one u block
    per_chan = n_off * L_pad * 4
    if C * per_chan <= budget:
        C_pad, cb = C, C                                  # one band of all channels
    else:
        C_pad = _round_up(C, 8)                           # bands must be 8-aligned
        cb = 8
        for d in range(1, C_pad // 8 + 1):
            cand = 8 * d
            if C_pad % cand == 0 and cand * per_chan <= budget:
                cb = cand
    if C_pad != C:
        u = jnp.pad(u, ((0, 0), (0, C_pad - C), (0, 0)))

    # --- lane banding only if even one 8-channel band overflows the budget --
    lb = L_pad
    if cb * n_off * lb * 4 > budget:
        max_lb = max(128, (budget // (cb * n_off * 4)) // 128 * 128)
        lb = 128
        for cand in range(128, L_pad + 1, 128):
            if L_pad % cand == 0 and cand <= max_lb:
                lb = cand

    n_cb = C_pad // cb
    n_lb = L_pad // lb
    step_bytes = 4 * (n_off * cb * lb + cb * lb + lb)
    vmem_limit = int(min(48 * 1024 * 1024, max(8 * 1024 * 1024, 6 * step_bytes)))

    kern = functools.partial(_fold_sum_kernel, n_off=n_off)
    out2 = pl.pallas_call(
        kern,
        out_shape=jax.ShapeDtypeStruct((C_pad, L_pad), jnp.float32),
        grid=(n_cb, n_lb),
        in_specs=[
            pl.BlockSpec((n_off, cb, lb), lambda c, l: (0, c, l)),
            pl.BlockSpec((1, lb), lambda c, l: (0, l)),
        ],
        out_specs=pl.BlockSpec((cb, lb), lambda c, l: (c, l)),
        compiler_params=pltpu.CompilerParams(
            dimension_semantics=("parallel", "parallel"),
            vmem_limit_bytes=vmem_limit,
        ),
    )(u, inv)

    return out2[:C, :L].reshape(C, row, col)[None]        # (1, C, row, col)


def _reference_block_fold(x, paddings, row, col, *, wsize=15, wstride=5):
    """Pure-JAX reference (same math as F.fold + fold-mask normalization)."""
    num, C = x.shape[0], x.shape[1]
    block_size1 = (row + 2 * paddings[2] - (wsize - 1) - 1) / wstride + 1
    block_size2 = (col + 2 * paddings[0] - (wsize - 1) - 1) / wstride + 1
    if block_size1 * block_size2 != num:
        pad_h, pad_w = paddings[3], paddings[1]
    else:
        pad_h, pad_w = paddings[2], paddings[0]
    n_w = (col + 2 * pad_w - wsize) // wstride + 1
    acc = jnp.zeros((C, row + 2 * pad_h, col + 2 * pad_w), jnp.float32)
    cnt = jnp.zeros_like(acc)
    for l in range(num):
        bh, bw = divmod(l, n_w)
        y0, x0 = bh * wstride, bw * wstride
        acc = acc.at[:, y0:y0 + wsize, x0:x0 + wsize].add(x[l])
        cnt = cnt.at[:, y0:y0 + wsize, x0:x0 + wsize].add(1.0)
    acc = acc[:, pad_h:pad_h + row, pad_w:pad_w + col]
    cnt = cnt[:, pad_h:pad_h + row, pad_w:pad_w + col]
    return (acc / cnt)[None]


if __name__ == "__main__":
    # small, consistent shapes: wsize=15, wstride=5, row=col=20, pad=5 each side
    # -> 4x4 = 16 blocks, 4 channels.
    wsize, wstride = 15, 5
    row, col = 20, 20
    paddings = (5, 5, 5, 5)  # (left, right, top, bottom), F.pad ordering
    C = 4
    n_h = (row + 2 * paddings[2] - wsize) // wstride + 1
    n_w = (col + 2 * paddings[0] - wsize) // wstride + 1
    num = n_h * n_w  # 16

    key = jax.random.PRNGKey(0)
    x = jax.random.normal(key, (num, C, wsize, wsize), dtype=jnp.float32)

    out = block_fold(x, paddings, row, col, wsize=wsize, wstride=wstride)
    out = jax.block_until_ready(out)

    ref = _reference_block_fold(x, paddings, row, col, wsize=wsize,
                                wstride=wstride)
    assert out.shape == (1, C, row, col), out.shape
    np.testing.assert_allclose(np.asarray(out), np.asarray(ref),
                               rtol=1e-5, atol=1e-5)
    print("KERNEL_OK")
</pallas_src>

<mosaic_0001>
module attributes {stable_mosaic.version = 11 : i64} {
  func.func @_fold_sum_kernel(%arg0: i32, %arg1: i32, %arg2: memref<9x4x512xf32, #tpu.memory_space<vmem>>, %arg3: memref<1x512xf32, #tpu.memory_space<vmem>>, %arg4: memref<4x512xf32, #tpu.memory_space<vmem>>) attributes {dimension_semantics = [#tpu.dimension_semantics<parallel>, #tpu.dimension_semantics<parallel>], iteration_bounds = array<i64: 1, 1>, scalar_prefetch = 0 : i64, scratch_operands = 0 : i64, tpu.core_type = #tpu.core_type<tc>, window_params = [{transform_indices = @transform_0, window_bounds = array<i64: 9, 4, 512>}, {transform_indices = @transform_1, window_bounds = array<i64: 1, 512>}, {transform_indices = @transform_2, window_bounds = array<i64: 4, 512>}]} {
    %c0 = arith.constant 0 : index
    %c0_0 = arith.constant 0 : index
    %c0_1 = arith.constant 0 : index
    %0 = vector.load %arg2[%c0, %c0_0, %c0_1] : memref<9x4x512xf32, #tpu.memory_space<vmem>>, vector<1x4x512xf32>
    %1 = vector.shape_cast %0 : vector<1x4x512xf32> to vector<4x512xf32>
    %c1 = arith.constant 1 : index
    %c0_2 = arith.constant 0 : index
    %c0_3 = arith.constant 0 : index
    %2 = vector.load %arg2[%c1, %c0_2, %c0_3] : memref<9x4x512xf32, #tpu.memory_space<vmem>>, vector<1x4x512xf32>
    %3 = vector.shape_cast %2 : vector<1x4x512xf32> to vector<4x512xf32>
    %4 = arith.addf %1, %3 : vector<4x512xf32>
    %c2 = arith.constant 2 : index
    %c0_4 = arith.constant 0 : index
    %c0_5 = arith.constant 0 : index
    %5 = vector.load %arg2[%c2, %c0_4, %c0_5] : memref<9x4x512xf32, #tpu.memory_space<vmem>>, vector<1x4x512xf32>
    %6 = vector.shape_cast %5 : vector<1x4x512xf32> to vector<4x512xf32>
    %7 = arith.addf %4, %6 : vector<4x512xf32>
    %c3 = arith.constant 3 : index
    %c0_6 = arith.constant 0 : index
    %c0_7 = arith.constant 0 : index
    %8 = vector.load %arg2[%c3, %c0_6, %c0_7] : memref<9x4x512xf32, #tpu.memory_space<vmem>>, vector<1x4x512xf32>
    %9 = vector.shape_cast %8 : vector<1x4x512xf32> to vector<4x512xf32>
    %10 = arith.addf %7, %9 : vector<4x512xf32>
    %c4 = arith.constant 4 : index
    %c0_8 = arith.constant 0 : index
    %c0_9 = arith.constant 0 : index
    %11 = vector.load %arg2[%c4, %c0_8, %c0_9] : memref<9x4x512xf32, #tpu.memory_space<vmem>>, vector<1x4x512xf32>
    %12 = vector.shape_cast %11 : vector<1x4x512xf32> to vector<4x512xf32>
    %13 = arith.addf %10, %12 : vector<4x512xf32>
    %c5 = arith.constant 5 : index
    %c0_10 = arith.constant 0 : index
    %c0_11 = arith.constant 0 : index
    %14 = vector.load %arg2[%c5, %c0_10, %c0_11] : memref<9x4x512xf32, #tpu.memory_space<vmem>>, vector<1x4x512xf32>
    %15 = vector.shape_cast %14 : vector<1x4x512xf32> to vector<4x512xf32>
    %16 = arith.addf %13, %15 : vector<4x512xf32>
    %c6 = arith.constant 6 : index
    %c0_12 = arith.constant 0 : index
    %c0_13 = arith.constant 0 : index
    %17 = vector.load %arg2[%c6, %c0_12, %c0_13] : memref<9x4x512xf32, #tpu.memory_space<vmem>>, vector<1x4x512xf32>
    %18 = vector.shape_cast %17 : vector<1x4x512xf32> to vector<4x512xf32>
    %19 = arith.addf %16, %18 : vector<4x512xf32>
    %c7 = arith.constant 7 : index
    %c0_14 = arith.constant 0 : index
    %c0_15 = arith.constant 0 : index
    %20 = vector.load %arg2[%c7, %c0_14, %c0_15] : memref<9x4x512xf32, #tpu.memory_space<vmem>>, vector<1x4x512xf32>
    %21 = vector.shape_cast %20 : vector<1x4x512xf32> to vector<4x512xf32>
    %22 = arith.addf %19, %21 : vector<4x512xf32>
    %c8 = arith.constant 8 : index
    %c0_16 = arith.constant 0 : index
    %c0_17 = arith.constant 0 : index
    %23 = vector.load %arg2[%c8, %c0_16, %c0_17] : memref<9x4x512xf32, #tpu.memory_space<vmem>>, vector<1x4x512xf32>
    %24 = vector.shape_cast %23 : vector<1x4x512xf32> to vector<4x512xf32>
    %25 = arith.addf %22, %24 : vector<4x512xf32>
    %c0_18 = arith.constant 0 : index
    %c0_19 = arith.constant 0 : index
    %26 = vector.load %arg3[%c0_18, %c0_19] : memref<1x512xf32, #tpu.memory_space<vmem>>, vector<1x512xf32>
    %27 = vector.broadcast %26 : vector<1x512xf32> to vector<4x512xf32>
    %28 = arith.mulf %25, %27 : vector<4x512xf32>
    %c0_20 = arith.constant 0 : index
    %c0_21 = arith.constant 0 : index
    %29 = vector.load %arg4[%c0_20, %c0_21] : memref<4x512xf32, #tpu.memory_space<vmem>>, vector<4x512xf32>
    tpu.vector_store %arg4[%c0_20, %c0_21], %28 {strides = array<i32>} : memref<4x512xf32, #tpu.memory_space<vmem>>, vector<4x512xf32>,
    return
  }
  func.func @transform_0(%arg0: i32, %arg1: i32) -> (i32, i32, i32) {
    %c0_i32 = arith.constant 0 : i32
    %c0_i32_0 = arith.constant 0 : i32
    return %c0_i32, %arg0, %arg1 : i32, i32, i32
  }
  func.func @transform_1(%arg0: i32, %arg1: i32) -> (i32, i32) {
    %c0_i32 = arith.constant 0 : i32
    %c0_i32_0 = arith.constant 0 : i32
    return %c0_i32, %arg1 : i32, i32
  }
  func.func @transform_2(%arg0: i32, %arg1: i32) -> (i32, i32) {
    %c0_i32 = arith.constant 0 : i32
    return %arg0, %arg1 : i32, i32
  }
}

</mosaic_0001>

<bundles_post_ra>
// kernel: tpu_custom_call.1
= control target key start
LH: loop header
LB: loop body
LE: loop exit
PB: predicated region body
PF: predicated region fallthrough
CT: control target
= control target key end

     0   :  { %7 = vsyncpa [#allocation3], 0  ;;  %s231_s0 = inlined_call_operand.hbm [shape: f32[9,4,512], index: 0, kind: input, shape index: {}]   ;;  %s232_s1 = inlined_call_operand.hbm [shape: f32[1,512], index: 1, kind: input, shape index: {}]   ;;  %s233_s2 = inlined_call_operand.hbm [shape: f32[4,512], index: 2, kind: output, shape index: {}]  }
   0x1   :  { %8 = vsyncpa [#allocation6], 0 }
   0x2   :  { %9 = vsyncpa [#allocation4], 0  ;;  %s14_s11 = sshll.u32 %s231_s0, 4  ;;  %s202_s12 = smov [#allocation2]   ;;  %s15_s11 = int_to_ptr.hbm [resolvable:$true] %s14_s11 }
   0x3   :  { %s16_s13 = sshll.u32 %s202_s12, 4  ;;  %s28_s16 = sshll.u32 %s232_s1, 4  ;;  %s17_s13 = int_to_ptr.vmem [resolvable:$true] %s16_s13  ;;  %s29_s16 = int_to_ptr.hbm [resolvable:$true] %s28_s16 }
   0x4   :  { %s203_s17 = smov 256   ;;  %s204_s18 = smov 16  }
   0x5   :  { %22 = dma.hbm_to_vmem [thread:$0]  %s15_s11, 2304, %s17_s13, [#allocation3], %s203_s17, %s203_s17, %s204_s18  }
   0x6   :  { %s205_s19 = smov [#allocation5]  }
   0x7   :  { %s30_s20 = sshll.u32 %s205_s19, 4  ;;  %s31_s20 = int_to_ptr.vmem [resolvable:$true] %s30_s20 }
   0x8   :  { %33 = dma.hbm_to_vmem [thread:$0]  %s29_s16, 64, %s31_s20, [#allocation6]  }
   0x9   :  { %196 = dma.done.wait [#allocation3], 2304  }
   0xa   :  { %197 = vsyncadd [#allocation3], 4294964992 }
   0xb   :  { %198 = dma.done.wait [#allocation6], 64  }
   0xc   :  { %199 = vsyncadd [#allocation6], 4294967232  ;;  %v42_v0 = vld [vmem:[#allocation2] sm:$0xff]  ;;  %v45_v1 = vld [vmem:[#allocation2 + $0x10] sm:$0xff]  ;;  %vm92_vm0 = vcmask 1043456   ;;  %s206_s0 = smov [#allocation7]  }
   0xd   :  { %v50_v2 = vld [vmem:[#allocation2 + $0x20] sm:$0xff]  ;;  %v47_v3 = vadd.f32 %v45_v1, %v42_v0  ;;  %v55_v4 = vld [vmem:[#allocation2 + $0x30] sm:$0xff]  ;;  %v43_v7 = vld [vmem:[#allocation2 + $0x8] sm:$0xff]  ;;  %s106_s1 = sshll.u32 %s206_s0, 4  ;;  %s108_s23 = sshll.u32 %s233_s2, 4  ;;  %s107_s1 = int_to_ptr.vmem [resolvable:$true] %s106_s1  ;;  %s109_s23 = int_to_ptr.hbm [resolvable:$true] %s108_s23 }
   0xe   :  { %v84_v6 = vld [vmem:[#allocation5] sm:$0xf]  ;;  %v46_v8 = vld [vmem:[#allocation2 + $0x18] sm:$0xff]  ;;  %v60_v9 = vld [vmem:[#allocation2 + $0x40] sm:$0xff] }
   0xf   :  { %v52_v5 = vadd.f32 %v50_v2, %v47_v3  ;;  %v48_v10 = vadd.f32 %v46_v8, %v43_v7  ;;  %v51_v11 = vld [vmem:[#allocation2 + $0x28] sm:$0xff]  ;;  %v56_v13 = vld [vmem:[#allocation2 + $0x38] sm:$0xff]  ;;  %v65_v14 = vld [vmem:[#allocation2 + $0x50] sm:$0xff]  ;;  %v87_v15 = vperm.slane %v84_v6, 1  ;;  %v89_v23 = vperm.slane %v84_v6, 3 }
  0x10   :  { %v61_v18 = vld [vmem:[#allocation2 + $0x48] sm:$0xff]  ;;  %v70_v19 = vld [vmem:[#allocation2 + $0x60] sm:$0xff]  ;;  %v66_v22 = vld [vmem:[#allocation2 + $0x58] sm:$0xff]  ;;  %v86_v25 = vperm.slane %v84_v6, 0  ;;  %v88_v34 = vperm.slane %v84_v6, 2 }
  0x11   :  { %v57_v12 = vadd.f32 %v55_v4, %v52_v5  ;;  %v53_v16 = vadd.f32 %v51_v11, %v48_v10  ;;  %v75_v24 = vld [vmem:[#allocation2 + $0x70] sm:$0xff]  ;;  %v90_v26 = vrot.slane %v87_v15, 4  ;;  %v71_v29 = vld [vmem:[#allocation2 + $0x68] sm:$0xff]  ;;  %v80_v30 = vld [vmem:[#allocation2 + $0x80] sm:$0xff]  ;;  %v91_v35 = vrot.slane %v89_v23, 4 }
  0x12   :  { %v76_v33 = vld [vmem:[#allocation2 + $0x78] sm:$0xff]  ;;  %v81_v39 = vld [vmem:[#allocation2 + $0x88] sm:$0xff] }
  0x13   :  { %v62_v17 = vadd.f32 %v60_v9, %v57_v12  ;;  %v58_v20 = vadd.f32 %v56_v13, %v53_v16  ;;  %v93_v36 = vsel %vm92_vm0, %v86_v25, %v90_v26  ;;  %v94_v42 = vsel %vm92_vm0, %v88_v34, %v91_v35 }
  0x15   :  { %v67_v21 = vadd.f32 %v65_v14, %v62_v17  ;;  %v63_v27 = vadd.f32 %v61_v18, %v58_v20 }
  0x17   :  { %v72_v28 = vadd.f32 %v70_v19, %v67_v21  ;;  %v68_v31 = vadd.f32 %v66_v22, %v63_v27 }
  0x19   :  { %v77_v32 = vadd.f32 %v75_v24, %v72_v28  ;;  %v73_v37 = vadd.f32 %v71_v29, %v68_v31 }
  0x1b   :  { %v82_v38 = vadd.f32 %v80_v30, %v77_v32  ;;  %v78_v40 = vadd.f32 %v76_v33, %v73_v37 }
  0x1d   :  { %v97_v41 = vmul.f32 %v93_v36, %v82_v38  ;;  %v83_v43 = vadd.f32 %v81_v39, %v78_v40 }
  0x1f   :  { %99 = vst [vmem:[#allocation7] sm:$0xff] %v97_v41  ;;  %v98_v44 = vmul.f32 %v94_v42, %v83_v43 }
  0x21   :  { %100 = vst [vmem:[#allocation7 + $0x8] sm:$0xff] %v98_v44 }
  0x22   :  { %111 = dma.vmem_to_hbm [thread:$0]  %s107_s1, 256, %s109_s23, [#allocation4]  }
  0x23   :  { %200 = dma.done.wait [#allocation4], 256  }
  0x24   :  { %201 = vsyncadd [#allocation4], 4294967040 }
  0x25   :  { %116 = vsyncpa [#allocation3], 1 }
  0x26   :  { %117 = vsyncpa [#allocation6], 1 }
  0x27   :  { %118 = vsyncpa [#allocation4], 1 }

</bundles_post_ra>
